<compile_context>
chip_gen: v6e
topology: v6e:2x2x1
jax: 0.10.0
libtpu: 0.0.40
codegen_flags: <defaults>
</compile_context>

<pallas_src>
import jax
import jax.numpy as jnp
from jax import lax
from jax.experimental import pallas as pl
from jax.experimental.pallas import tpu as pltpu


# ----------------------------------------------------------------------------
# Pallas kernel: fused (im2col'd) 3x3 conv + BN bias + LeakyReLU
# ----------------------------------------------------------------------------
def _conv_bn_lrelu_kernel(p_ref, w_ref, b_ref, o_ref):
    # p_ref: (K, M)    im2col patches, K = 9*Cin, M = N*H2*W2 on the lane axis
    # w_ref: (Cout, K) BN-scale-folded conv weights
    # b_ref: (Cout, 1) fused BN bias = beta - mean * scale
    # o_ref: (Cout, M) lane-dense output
    acc = jnp.dot(w_ref[...], p_ref[...],
                  preferred_element_type=jnp.float32)   # single K=36 MXU dot
    y = acc + b_ref[...]                                # fused BN bias
    y = jnp.where(y >= 0, y, 0.1 * y)                   # LeakyReLU(0.1) on VPU
    o_ref[...] = y.astype(o_ref.dtype)


# ----------------------------------------------------------------------------
# Full module forward: Pixel_shuffle(in_channels, out_channels)
# ----------------------------------------------------------------------------
def pixel_shuffle_module(x_nchw, w_oihw, bn_gamma, bn_beta, bn_mean, bn_var,
                         eps=1e-5):
    N, C4, H, W = x_nchw.shape
    r = 2
    Cin = C4 // (r * r)
    Cout = w_oihw.shape[0]
    H2, W2 = H * r, W * r
    M = N * H2 * W2
    K = 9 * Cin

    # Layout assumptions (see review correctness note): f32 activations and
    # Cout a multiple of 8 keep the (Cout, M) output on full (8,128) tiles.
    assert x_nchw.dtype == jnp.float32
    assert Cout % 8 == 0, "Cout must be a multiple of 8 for unmasked stores"
    assert M % 128 == 0, "M = N*2H*2W must be a multiple of 128 (lane axis)"

    # --- PixelShuffle(2), fused with NCHW -> NHWC (one XLA copy) --------------
    x = x_nchw.reshape(N, Cin, r, r, H, W)
    x = jnp.transpose(x, (0, 4, 2, 5, 3, 1))             # N, H, r, W, r, Cin
    x_nhwc = x.reshape(N, H2, W2, Cin).astype(jnp.float32)

    # --- pad + im2col in the wrapper (XLA handles this fine at this size) -----
    xp = jnp.pad(x_nhwc, ((0, 0), (1, 1), (1, 1), (0, 0)))
    taps = [xp[:, ky:ky + H2, kx:kx + W2, :]             # (N, H2, W2, Cin)
            for ky in range(3) for kx in range(3)]
    patches = jnp.stack(taps, axis=0)                    # (9, N, H2, W2, Cin)
    patches = jnp.transpose(patches, (0, 4, 1, 2, 3))    # (9, Cin, N, H2, W2)
    patches = patches.reshape(K, M)                      # lane-dense on M

    # --- fold BatchNorm (eval) into conv weights / bias ------------------------
    scale = bn_gamma / jnp.sqrt(bn_var + eps)            # (Cout,)
    bias = bn_beta - bn_mean * scale                     # (Cout,)
    w_folded = (w_oihw * scale[:, None, None, None]).astype(jnp.float32)
    # (Cout, Cin, 3, 3) -> (Cout, ky, kx, Cin) -> (Cout, 9*Cin); row index
    # (ky*3+kx)*Cin + c matches the patch-matrix row ordering above.
    w2d = jnp.transpose(w_folded, (0, 2, 3, 1)).reshape(Cout, K)
    b_col = bias.reshape(Cout, 1).astype(jnp.float32)

    out2d = pl.pallas_call(
        _conv_bn_lrelu_kernel,
        out_shape=jax.ShapeDtypeStruct((Cout, M), jnp.float32),
        in_specs=[
            pl.BlockSpec(memory_space=pltpu.MemorySpace.VMEM),
            pl.BlockSpec(memory_space=pltpu.MemorySpace.VMEM),
            pl.BlockSpec(memory_space=pltpu.MemorySpace.VMEM),
        ],
        out_specs=pl.BlockSpec(memory_space=pltpu.MemorySpace.VMEM),
    )(patches, w2d, b_col)

    # --- back to the module's NCHW interface -----------------------------------
    out = out2d.reshape(Cout, N, H2, W2)
    return jnp.transpose(out, (1, 0, 2, 3))              # (N, Cout, 2H, 2W)


# ----------------------------------------------------------------------------
# Reference (pure JAX/XLA) for the correctness spot-check.
# ----------------------------------------------------------------------------
def _reference(x_nchw, w_oihw, bn_gamma, bn_beta, bn_mean, bn_var, eps=1e-5):
    N, C4, H, W = x_nchw.shape
    Cin = C4 // 4
    x = x_nchw.reshape(N, Cin, 2, 2, H, W)
    x = jnp.transpose(x, (0, 1, 4, 2, 5, 3)).reshape(N, Cin, 2 * H, 2 * W)
    y = lax.conv_general_dilated(
        x, w_oihw, window_strides=(1, 1), padding=((1, 1), (1, 1)),
        dimension_numbers=("NCHW", "OIHW", "NCHW"))
    scale = (bn_gamma / jnp.sqrt(bn_var + eps)).reshape(1, -1, 1, 1)
    bias = (bn_beta - bn_mean * bn_gamma / jnp.sqrt(bn_var + eps)).reshape(1, -1, 1, 1)
    y = y * scale + bias
    return jnp.where(y >= 0, y, 0.1 * y)


if __name__ == "__main__":
    # Module config: Pixel_shuffle(in_channels=4, out_channels=8).
    # The module input carries 4*in_channels channels (PixelShuffle(2) divides
    # channels by 4 before the conv).
    in_channels, out_channels = 4, 8
    N, H, W = 2, 8, 8
    key = jax.random.PRNGKey(0)
    k_x, k_w, k_g, k_b, k_m, k_v = jax.random.split(key, 6)

    x = jax.random.normal(k_x, (N, 4 * in_channels, H, W), jnp.float32)

    # Deterministic synthetic parameters.
    w_oihw = 0.1 * jax.random.normal(k_w, (out_channels, in_channels, 3, 3),
                                     jnp.float32)
    bn_gamma = 1.0 + 0.1 * jax.random.normal(k_g, (out_channels,), jnp.float32)
    bn_beta = 0.1 * jax.random.normal(k_b, (out_channels,), jnp.float32)
    bn_mean = 0.05 * jax.random.normal(k_m, (out_channels,), jnp.float32)
    bn_var = jnp.abs(1.0 + 0.1 * jax.random.normal(k_v, (out_channels,),
                                                   jnp.float32))

    fwd = jax.jit(pixel_shuffle_module)
    out = jax.block_until_ready(fwd(x, w_oihw, bn_gamma, bn_beta, bn_mean, bn_var))

    ref = _reference(x, w_oihw, bn_gamma, bn_beta, bn_mean, bn_var)
    assert out.shape == (N, out_channels, 2 * H, 2 * W)
    assert float(jnp.max(jnp.abs(out - ref))) < 2e-4

    print("KERNEL_OK")
</pallas_src>

<mosaic_0001>
module attributes {stable_mosaic.version = 11 : i64} {
  func.func @_conv_bn_lrelu_kernel(%arg0: memref<36x512xf32, #tpu.memory_space<vmem>>, %arg1: memref<8x36xf32, #tpu.memory_space<vmem>>, %arg2: memref<8x1xf32, #tpu.memory_space<vmem>>, %arg3: memref<8x512xf32, #tpu.memory_space<vmem>>) attributes {dimension_semantics = [], scalar_prefetch = 0 : i64, scratch_operands = 0 : i64, tpu.core_type = #tpu.core_type<tc>} {
    %c0 = arith.constant 0 : index
    %c0_0 = arith.constant 0 : index
    %0 = vector.load %arg1[%c0, %c0_0] : memref<8x36xf32, #tpu.memory_space<vmem>>, vector<8x36xf32>
    %c0_1 = arith.constant 0 : index
    %c0_2 = arith.constant 0 : index
    %1 = vector.load %arg0[%c0_1, %c0_2] : memref<36x512xf32, #tpu.memory_space<vmem>>, vector<36x512xf32>
    %cst = arith.constant dense<0.000000e+00> : vector<8x512xf32>
    %2 = tpu.matmul %0, %1, %cst {dimension_numbers = #tpu.dot_dimension_numbers<[1], [0], [0], [1], [0, 0, 1, 1], [], []>} : vector<8x36xf32>, vector<36x512xf32>, vector<8x512xf32> -> vector<8x512xf32>
    %c0_3 = arith.constant 0 : index
    %c0_4 = arith.constant 0 : index
    %3 = vector.load %arg2[%c0_3, %c0_4] : memref<8x1xf32, #tpu.memory_space<vmem>>, vector<8x1xf32>
    %4 = vector.broadcast %3 : vector<8x1xf32> to vector<8x512xf32>
    %5 = arith.addf %2, %4 : vector<8x512xf32>
    %cst_5 = arith.constant 0.000000e+00 : f32
    %6 = vector.broadcast %cst_5 : f32 to vector<8x512xf32>
    %7 = arith.cmpf oge, %5, %6 : vector<8x512xf32>
    %cst_6 = arith.constant 1.000000e-01 : f32
    %8 = vector.broadcast %cst_6 : f32 to vector<8x512xf32>
    %9 = arith.mulf %8, %5 : vector<8x512xf32>
    %10 = arith.select %7, %5, %9 : vector<8x512xi1>, vector<8x512xf32>
    %c0_7 = arith.constant 0 : index
    %c0_8 = arith.constant 0 : index
    %11 = vector.load %arg3[%c0_7, %c0_8] : memref<8x512xf32, #tpu.memory_space<vmem>>, vector<8x512xf32>
    tpu.vector_store %arg3[%c0_7, %c0_8], %10 {strides = array<i32>} : memref<8x512xf32, #tpu.memory_space<vmem>>, vector<8x512xf32>,
    return
  }
}

</mosaic_0001>

<bundles_post_ra>
// kernel: pixel_shuffle_module.1
= control target key start
LH: loop header
LB: loop body
LE: loop exit
PB: predicated region body
PF: predicated region fallthrough
CT: control target
= control target key end

     0   :  { %vm45_vm0 = vcmask 1043456   ;;  %v229_v3 = vmov 0.0   ;;  %vm41_vm1 = vcmask 293888   ;;  %v230_v23 = vmov 0   ;;  %s329_s0 = inlined_call_operand.vmem [shape: f32[36,512], index: 0, kind: input, shape index: {}]   ;;  %s330_s1 = inlined_call_operand.vmem [shape: f32[8,36], index: 1, kind: input, shape index: {}]   ;;  %s331_s2 = inlined_call_operand.vmem [shape: f32[8,1], index: 2, kind: input, shape index: {}]   ;;  %s332_s3 = inlined_call_operand.vmem [shape: f32[8,512], index: 3, kind: output, shape index: {}]  }
   0x1   :  { %v32_v0 = vld [vmem:[%s329_s0 + $0x88] sm:$0xf]  ;;  %v34_v1 = vld [vmem:[%s329_s0 + $0x98] sm:$0xf]  ;;  %v31_v2 = vld [vmem:[%s329_s0 + $0x80] sm:$0xf]  ;;  %122 = vmatprep.mubr.f32.mxu0 %v229_v3  ;;  %193 = vmatprep.mubr.f32.mxu1 %v229_v3 }
   0x2   :  { %220 = vmatprep.subr.msk.mxu0 %vm45_vm0, %v32_v0  ;;  %223 = vmatprep.subr.msk.mxu1 %vm45_vm0, %v34_v1  ;;  %v33_v4 = vld [vmem:[%s329_s0 + $0x90] sm:$0xf]  ;;  %v28_v5 = vld [vmem:[%s329_s0 + $0x68] sm:$0xff]  ;;  %v30_v6 = vld [vmem:[%s329_s0 + $0x78] sm:$0xff] }
   0x3   :  { %221 = vmatpush1.msk.msra.mxu0 %vm45_vm0, %v31_v2  ;;  %224 = vmatpush1.msk.msra.mxu1 %vm45_vm0, %v33_v4  ;;  %v27_v7 = vld [vmem:[%s329_s0 + $0x60] sm:$0xff]  ;;  %v29_v8 = vld [vmem:[%s329_s0 + $0x70] sm:$0xff]  ;;  %v24_v9 = vld [vmem:[%s329_s0 + $0x48] sm:$0xff] }
   0x4   :  { %82 = vmatprep.subr.mxu0 %v28_v5  ;;  %153 = vmatprep.subr.mxu1 %v30_v6  ;;  %v26_v10 = vld [vmem:[%s329_s0 + $0x58] sm:$0xff]  ;;  %v23_v11 = vld [vmem:[%s329_s0 + $0x40] sm:$0xff]  ;;  %v25_v12 = vld [vmem:[%s329_s0 + $0x50] sm:$0xff] }
   0x5   :  { %83 = vmatpush1.msra.mxu0 %v27_v7  ;;  %154 = vmatpush1.msra.mxu1 %v29_v8  ;;  %v20_v13 = vld [vmem:[%s329_s0 + $0x28] sm:$0xff]  ;;  %v22_v14 = vld [vmem:[%s329_s0 + $0x38] sm:$0xff]  ;;  %v19_v15 = vld [vmem:[%s329_s0 + $0x20] sm:$0xff] }
   0x6   :  { %84 = vmatprep.subr.mxu0 %v24_v9  ;;  %155 = vmatprep.subr.mxu1 %v26_v10  ;;  %v21_v16 = vld [vmem:[%s329_s0 + $0x30] sm:$0xff]  ;;  %v16_v17 = vld [vmem:[%s329_s0 + $0x8] sm:$0xff]  ;;  %v18_v18 = vld [vmem:[%s329_s0 + $0x18] sm:$0xff] }
   0x7   :  { %85 = vmatpush1.msra.mxu0 %v23_v11  ;;  %156 = vmatpush1.msra.mxu1 %v25_v12  ;;  %v15_v19 = vld [vmem:[%s329_s0] sm:$0xff]  ;;  %v17_v20 = vld [vmem:[%s329_s0 + $0x10] sm:$0xff] }
   0x8   :  { %86 = vmatprep.subr.mxu0 %v20_v13  ;;  %157 = vmatprep.subr.mxu1 %v22_v14  ;;  %v14_v21 = vld [vmem:[%s330_s1] sm:$0xff] }
   0x9   :  { %87 = vmatpush1.msra.mxu0 %v19_v15  ;;  %158 = vmatpush1.msra.mxu1 %v21_v16  ;;  %v35_v22 = vld [vmem:[%s331_s2] sm:$0xff] }
   0xa   :  { %88 = vmatprep.subr.mxu0 %v16_v17  ;;  %159 = vmatprep.subr.mxu1 %v18_v18 }
   0xb   :  { %89 = vmatpush1.msra.mxu0 %v15_v19  ;;  %160 = vmatpush1.msra.mxu1 %v17_v20 }
   0xc   :  { %222 = vmatmul.mubr.msk.f32.vlgmr.msra.gmra.mxu0 %vm41_vm1, %v14_v21  ;;  %225 = vmatmul.mubr.msk.f32.vlgmr.msra.gmra.mxu1 %vm41_vm1, %v14_v21 }
   0xd   :  { %228 = vset.pattern.permute.xlu0 %v230_v23 }
   0xe   :  { %38 = vperm.xlu0 %228, %v35_v22  }
  0x89   :  { %v39_v24 = vpop.permute.xlu0 %38 }
  0xcc   :  { %v124_v25 = vpop.f32.mrf.mxu0  ;;  %v195_v26 = vpop.f32.mrf.mxu1 }
  0xcd   :  { %v125_v27 = vadd.f32 %v124_v25, %v39_v24  ;;  %v196_v28 = vadd.f32 %v195_v26, %v39_v24 }
  0xce   :  { %v126_v29 = vpop.f32.mrf.mxu0  ;;  %v197_v30 = vpop.f32.mrf.mxu1 }
  0xcf   :  { %vm200_vm2 = vcmp.ge.f32.partialorder %v125_v27, 0.0  ;;  %v204_v31 = vmul.f32 0.1, %v125_v27  ;;  %vm202_vm3 = vcmp.ge.f32.partialorder %v196_v28, 0.0  ;;  %v206_v32 = vmul.f32 0.1, %v196_v28 }
  0xd0   :  { %v127_v33 = vadd.f32 %v126_v29, %v39_v24  ;;  %v198_v34 = vadd.f32 %v197_v30, %v39_v24 }
  0xd1   :  { %v208_v35 = vsel %vm200_vm2, %v125_v27, %v204_v31  ;;  %v210_v36 = vsel %vm202_vm3, %v196_v28, %v206_v32 }
  0xd2   :  { %212 = vst [vmem:[%s332_s3] sm:$0xff] %v208_v35  ;;  %214 = vst [vmem:[%s332_s3 + $0x10] sm:$0xff] %v210_v36  ;;  %vm201_vm4 = vcmp.ge.f32.partialorder %v127_v33, 0.0  ;;  %v205_v37 = vmul.f32 0.1, %v127_v33  ;;  %vm203_vm5 = vcmp.ge.f32.partialorder %v198_v34, 0.0 }
  0xd3   :  { %v207_v38 = vmul.f32 0.1, %v198_v34 }
  0xd4   :  { %v209_v39 = vsel %vm201_vm4, %v127_v33, %v205_v37 }
  0xd5   :  { %v211_v40 = vsel %vm203_vm5, %v198_v34, %v207_v38  ;;  %213 = vst [vmem:[%s332_s3 + $0x8] sm:$0xff] %v209_v39 }
  0xd6   :  { %215 = vst [vmem:[%s332_s3 + $0x18] sm:$0xff] %v211_v40 }

</bundles_post_ra>
